<compile_context>
chip_gen: v6e
topology: v6e:2x2x1
jax: 0.10.0
libtpu: 0.0.40
codegen_flags: <defaults>
</compile_context>

<pallas_src>
import math

import jax
import jax.numpy as jnp
from jax.experimental import pallas as pl
from jax.experimental.pallas import tpu as pltpu


# ---------------------------------------------------------------------------
# helpers
# ---------------------------------------------------------------------------

def _round_up(a, b):
    return ((a + b - 1) // b) * b


def _detect_chip():
    try:
        kind = jax.devices()[0].device_kind.lower()
    except Exception:
        return "unknown"
    if "v5 lite" in kind or "v5lite" in kind or "v5e" in kind:
        return "v5e"
    if "v6" in kind:
        return "v6e"
    if "v7" in kind:
        return "v7x"
    return "unknown"


# Per-generation tuning (roofline knees: v5e ~240, v7x ~310, v6e ~700 FLOP/B):
#   tm        : row tile over M = batch*seq (weight pass serves tm rows)
#   tf        : d_ff tile in the streamed path
#   vmem      : vmem_limit_bytes handed to Mosaic
#   w_buffers : pipeline depth for streamed weight tiles (v5e: slow HBM)
#   m_cores   : TensorCores fed by the "parallel" M axis (v7x megacore)
_CHIP_CFG = {
    "v5e":     dict(tm=512,  tf=512, vmem=96 << 20,  w_buffers=3, m_cores=1),
    "v6e":     dict(tm=1024, tf=512, vmem=100 << 20, w_buffers=2, m_cores=1),
    "v7x":     dict(tm=512,  tf=256, vmem=56 << 20,  w_buffers=2, m_cores=2),
    "unknown": dict(tm=512,  tf=512, vmem=48 << 20,  w_buffers=2, m_cores=1),
}


def _weight_spec(shape, index_map, buffers):
    """BlockSpec for a streamed weight tile; deeper prefetch when requested."""
    if buffers and buffers > 2 and hasattr(pl, "Buffered"):
        try:
            return pl.BlockSpec(shape, index_map, pipeline_mode=pl.Buffered(buffers))
        except TypeError:  # older jax without pipeline_mode kwarg
            pass
    return pl.BlockSpec(shape, index_map)


def _resident_bytes(tm, dmp, dffp, out_isz, cdt_isz):
    w = 2 * cdt_isz * (dmp * dffp + dffp * dmp)   # w1 + w2, double-buffered alloc
    xio = 2 * tm * dmp * (cdt_isz + out_isz)      # x in + out, double-buffered
    h = tm * dffp * (4 + cdt_isz)                 # f32 hidden + low-precision recast
    b = 2 * 4 * (dffp + dmp) * 2                  # biases (noise)
    return w + xio + h + b


def _stream_bytes(tm, tf, dmp, out_isz, cdt_isz, w_buffers, inplace):
    w = w_buffers * cdt_isz * (dmp * tf + tf * dmp)
    x = 2 * tm * dmp * cdt_isz
    out = 2 * tm * dmp * out_isz
    acc = 0 if inplace else tm * dmp * 4
    h = tm * tf * (4 + cdt_isz)
    b = 2 * 4 * (tf + dmp) * 2
    return w + x + out + acc + h + b


# ---------------------------------------------------------------------------
# kernels
# ---------------------------------------------------------------------------

def _ffn_resident_kernel(x_ref, w1_ref, b1_ref, w2_ref, b2_ref, o_ref):
    # Single pass: both weight matrices fully resident in VMEM.
    h = jnp.dot(x_ref[...], w1_ref[...], preferred_element_type=jnp.float32)
    h = jnp.maximum(h + b1_ref[...], 0.0)
    # Dropout (eval mode): identity.
    y = jnp.dot(h.astype(w2_ref.dtype), w2_ref[...],
                preferred_element_type=jnp.float32)
    o_ref[...] = (y + b2_ref[...]).astype(o_ref.dtype)


def _ffn_stream_inplace_kernel(x_ref, w1_ref, b1_ref, w2_ref, b2_ref, o_ref):
    # Streamed d_ff tiles; f32 output block is resident across the f axis and
    # doubles as the accumulator (no scratch, one fewer VMEM stream per step).
    f = pl.program_id(1)

    @pl.when(f == 0)
    def _init():
        # Fold the second bias into the accumulator init (once per M tile).
        o_ref[...] = jnp.broadcast_to(b2_ref[...], o_ref.shape)

    h = jnp.dot(x_ref[...], w1_ref[...], preferred_element_type=jnp.float32)
    h = jnp.maximum(h + b1_ref[...], 0.0)
    o_ref[...] += jnp.dot(h.astype(w2_ref.dtype), w2_ref[...],
                          preferred_element_type=jnp.float32)


def _ffn_stream_scratch_kernel(x_ref, w1_ref, b1_ref, w2_ref, b2_ref, o_ref,
                               acc_ref):
    # Streamed d_ff tiles with an f32 scratch accumulator (non-f32 outputs).
    f = pl.program_id(1)

    @pl.when(f == 0)
    def _init():
        acc_ref[...] = jnp.broadcast_to(b2_ref[...], acc_ref.shape)

    h = jnp.dot(x_ref[...], w1_ref[...], preferred_element_type=jnp.float32)
    h = jnp.maximum(h + b1_ref[...], 0.0)
    acc_ref[...] += jnp.dot(h.astype(w2_ref.dtype), w2_ref[...],
                            preferred_element_type=jnp.float32)

    @pl.when(f == pl.num_programs(1) - 1)
    def _finalize():
        o_ref[...] = acc_ref[...].astype(o_ref.dtype)


# ---------------------------------------------------------------------------
# wrappers
# ---------------------------------------------------------------------------

def prepare_ffn_weights(w1, b1, w2, b2, *, compute_dtype=jnp.bfloat16):
    """One-time weight prep (hoisted out of the per-call path).

    Weights are stored transposed relative to nn.Linear: w1 (d_model, d_ff),
    w2 (d_ff, d_model). `compute_dtype` surfaces the MXU precision tradeoff
    (bf16 by default; pass jnp.float32 for full-precision weights).
    """
    d_model, d_ff = w1.shape
    dmp = _round_up(d_model, 128)
    dffp = _round_up(d_ff, 128)
    w1p = jnp.pad(w1, ((0, dmp - d_model), (0, dffp - d_ff))).astype(compute_dtype)
    w2p = jnp.pad(w2, ((0, dffp - d_ff), (0, dmp - d_model))).astype(compute_dtype)
    b1p = jnp.pad(b1, (0, dffp - d_ff)).reshape(1, dffp).astype(jnp.float32)
    b2p = jnp.pad(b2, (0, dmp - d_model)).reshape(1, dmp).astype(jnp.float32)
    return dict(w1=w1p, b1=b1p, w2=w2p, b2=b2p,
                d_model=d_model, d_ff=d_ff, compute_dtype=compute_dtype)


def feed_forward(x, params, *, tm=None, tf=None, vmem_limit_bytes=None,
                 force_streamed=False, chip=None):
    """x: (..., d_model) -> (..., d_model), using pre-padded `params`."""
    d_model = params["d_model"]
    assert x.shape[-1] == d_model, "last dim of x must be d_model"
    batch_shape = x.shape[:-1]
    M = int(math.prod(batch_shape)) if batch_shape else 1

    w1p, b1p, w2p, b2p = params["w1"], params["b1"], params["w2"], params["b2"]
    cdt = params["compute_dtype"]
    dmp, dffp = w1p.shape
    out_dtype = x.dtype
    out_isz = jnp.dtype(out_dtype).itemsize
    cdt_isz = jnp.dtype(cdt).itemsize

    chip = chip or _detect_chip()
    cfg = _CHIP_CFG.get(chip, _CHIP_CFG["unknown"])
    vmem_limit = vmem_limit_bytes or cfg["vmem"]
    budget = max(vmem_limit - (6 << 20), 8 << 20)  # headroom for compiler temps

    # --- row tile: multiple of 16 (bf16 sublane packing), of 256 for large M.
    align = 256 if M >= 256 else 16
    if tm is None:
        tm = cfg["tm"]
    tm = max(align, _round_up(min(tm, _round_up(M, align)), align))

    # v7x megacore: keep >=2 M tiles so the "parallel" axis feeds both cores.
    if cfg["m_cores"] >= 2 and M >= 2 * align and _round_up(M, tm) // tm < 2:
        tm = max(align, _round_up((M + 1) // 2, align))

    def _fits_resident(t):
        return _resident_bytes(t, dmp, dffp, out_isz, cdt_isz) <= budget

    use_resident = (not force_streamed) and _fits_resident(align)

    if use_resident:
        # Largest tm (<= requested) that keeps both weights resident.
        while tm > align and not _fits_resident(tm):
            tm = max(align, (tm // 2) // align * align)
    else:
        # d_ff tile: largest multiple of 128 that divides d_ff_pad, <= target.
        if tf is None:
            tf = cfg["tf"]
        tf = max(128, min((tf // 128) * 128, dffp))
        while dffp % tf != 0:
            tf -= 128
        inplace_acc = (out_dtype == jnp.float32)

        def _fits_stream(t):
            return _stream_bytes(t, tf, dmp, out_isz, cdt_isz,
                                 cfg["w_buffers"], inplace_acc) <= budget

        while tm > align and not _fits_stream(tm):
            tm = max(align, (tm // 2) // align * align)

    m_pad = _round_up(M, tm)
    n_m_tiles = m_pad // tm

    # --- activations only: cast + pad per call (weights were prepped once). --
    x2d = x.reshape(M, d_model).astype(cdt)
    if m_pad > M or dmp > d_model:
        x2d = jnp.pad(x2d, ((0, m_pad - M), (0, dmp - d_model)))

    weight_bytes = (w1p.size + w2p.size) * cdt_isz
    weight_passes = 1 if use_resident else n_m_tiles
    cost = pl.CostEstimate(
        flops=2 * 2 * m_pad * dmp * dffp,
        transcendentals=0,
        bytes_accessed=(x2d.size * cdt_isz
                        + weight_passes * weight_bytes
                        + 4 * (b1p.size + b2p.size)
                        + m_pad * dmp * out_isz),
    )

    if use_resident:
        out2d = pl.pallas_call(
            _ffn_resident_kernel,
            out_shape=jax.ShapeDtypeStruct((m_pad, dmp), out_dtype),
            grid_spec=pltpu.PrefetchScalarGridSpec(
                num_scalar_prefetch=0,
                grid=(n_m_tiles,),
                in_specs=[
                    pl.BlockSpec((tm, dmp), lambda i: (i, 0)),     # x rows
                    pl.BlockSpec((dmp, dffp), lambda i: (0, 0)),   # w1 resident
                    pl.BlockSpec((1, dffp), lambda i: (0, 0)),     # b1
                    pl.BlockSpec((dffp, dmp), lambda i: (0, 0)),   # w2 resident
                    pl.BlockSpec((1, dmp), lambda i: (0, 0)),      # b2
                ],
                out_specs=pl.BlockSpec((tm, dmp), lambda i: (i, 0)),
            ),
            compiler_params=pltpu.CompilerParams(
                dimension_semantics=("parallel",),
                vmem_limit_bytes=vmem_limit,
            ),
            cost_estimate=cost,
        )(x2d, w1p, b1p, w2p, b2p)
    else:
        in_specs = [
            pl.BlockSpec((tm, dmp), lambda i, f: (i, 0)),                   # x rows
            _weight_spec((dmp, tf), lambda i, f: (0, f), cfg["w_buffers"]),  # w1 col
            pl.BlockSpec((1, tf), lambda i, f: (0, f)),                     # b1 tile
            _weight_spec((tf, dmp), lambda i, f: (f, 0), cfg["w_buffers"]),  # w2 row
            pl.BlockSpec((1, dmp), lambda i, f: (0, 0)),                    # b2
        ]
        if inplace_acc:
            kernel = _ffn_stream_inplace_kernel
            scratch = []
        else:
            kernel = _ffn_stream_scratch_kernel
            scratch = [pltpu.VMEM((tm, dmp), jnp.float32)]
        out2d = pl.pallas_call(
            kernel,
            out_shape=jax.ShapeDtypeStruct((m_pad, dmp), out_dtype),
            grid_spec=pltpu.PrefetchScalarGridSpec(
                num_scalar_prefetch=0,
                grid=(n_m_tiles, dffp // tf),
                in_specs=in_specs,
                out_specs=pl.BlockSpec((tm, dmp), lambda i, f: (i, 0)),
                scratch_shapes=scratch,
            ),
            compiler_params=pltpu.CompilerParams(
                dimension_semantics=("parallel", "arbitrary"),
                vmem_limit_bytes=vmem_limit,
            ),
            cost_estimate=cost,
        )(x2d, w1p, b1p, w2p, b2p)

    return out2d[:M, :d_model].reshape(*batch_shape, d_model)


def reference(x, w1, b1, w2, b2, compute_dtype=jnp.float32):
    cd = compute_dtype
    h = jnp.dot(x.astype(cd), w1.astype(cd),
                preferred_element_type=jnp.float32) + b1
    h = jnp.maximum(h, 0.0)
    y = jnp.dot(h.astype(cd), w2.astype(cd),
                preferred_element_type=jnp.float32) + b2
    return y


# ---------------------------------------------------------------------------
# self-test
# ---------------------------------------------------------------------------

if __name__ == "__main__":
    batch, seq, d_model, d_ff = 2, 8, 32, 64

    key = jax.random.PRNGKey(0)
    kx, kw1, kb1, kw2, kb2 = jax.random.split(key, 5)

    x = jax.random.normal(kx, (batch, seq, d_model), dtype=jnp.float32)

    # Deterministic init mimicking nn.Linear's uniform(-1/sqrt(fan_in), ...).
    lim1 = 1.0 / math.sqrt(d_model)
    lim2 = 1.0 / math.sqrt(d_ff)
    w1 = jax.random.uniform(kw1, (d_model, d_ff), jnp.float32, -lim1, lim1)
    b1 = jax.random.uniform(kb1, (d_ff,), jnp.float32, -lim1, lim1)
    w2 = jax.random.uniform(kw2, (d_ff, d_model), jnp.float32, -lim2, lim2)
    b2 = jax.random.uniform(kb2, (d_model,), jnp.float32, -lim2, lim2)

    # Weight prep (pad + bf16 cast) done once, outside the hot path.
    params = prepare_ffn_weights(w1, b1, w2, b2)

    # --- Path 1: weights-resident single-pass kernel (default at this size) --
    out = jax.block_until_ready(feed_forward(x, params))
    assert out.shape == (batch, seq, d_model)

    ref_bf16 = reference(x, w1, b1, w2, b2, compute_dtype=jnp.bfloat16)
    ref_f32 = reference(x, w1, b1, w2, b2, compute_dtype=jnp.float32)
    assert jnp.allclose(out, ref_bf16, atol=5e-3, rtol=5e-3), "resident vs bf16 ref"
    assert jnp.allclose(out, ref_f32, atol=5e-2, rtol=5e-2), "resident vs f32 ref"

    # --- Path 2: streamed d_ff reduction, f32 output accumulated in-place ----
    d_ff2 = 256
    kw1b, kb1b, kw2b, kb2b = jax.random.split(jax.random.PRNGKey(1), 4)
    lim2b = 1.0 / math.sqrt(d_ff2)
    w1b = jax.random.uniform(kw1b, (d_model, d_ff2), jnp.float32, -lim1, lim1)
    b1b = jax.random.uniform(kb1b, (d_ff2,), jnp.float32, -lim1, lim1)
    w2b = jax.random.uniform(kw2b, (d_ff2, d_model), jnp.float32, -lim2b, lim2b)
    b2b = jax.random.uniform(kb2b, (d_model,), jnp.float32, -lim2b, lim2b)
    params_b = prepare_ffn_weights(w1b, b1b, w2b, b2b)

    out_s = jax.block_until_ready(
        feed_forward(x, params_b, tf=128, force_streamed=True))
    ref_s = reference(x, w1b, b1b, w2b, b2b, compute_dtype=jnp.bfloat16)
    assert jnp.allclose(out_s, ref_s, atol=5e-3, rtol=5e-3), "streamed in-place"

    # --- Path 3: streamed with bf16 output (scratch-accumulator variant) -----
    out_b = jax.block_until_ready(
        feed_forward(x.astype(jnp.bfloat16), params_b, tf=128, force_streamed=True))
    assert out_b.dtype == jnp.bfloat16
    assert jnp.allclose(out_b.astype(jnp.float32), ref_s, atol=2e-2, rtol=2e-2), \
        "streamed scratch (bf16 out)"

    print("KERNEL_OK")
</pallas_src>

<mosaic_0001>
module attributes {stable_mosaic.version = 11 : i64} {
  func.func @_ffn_resident_kernel(%arg0: i32, %arg1: memref<16x128xbf16, #tpu.memory_space<vmem>>, %arg2: memref<128x128xbf16, #tpu.memory_space<vmem>>, %arg3: memref<1x128xf32, #tpu.memory_space<vmem>>, %arg4: memref<128x128xbf16, #tpu.memory_space<vmem>>, %arg5: memref<1x128xf32, #tpu.memory_space<vmem>>, %arg6: memref<16x128xf32, #tpu.memory_space<vmem>>) attributes {dimension_semantics = [#tpu.dimension_semantics<parallel>], iteration_bounds = array<i64: 1>, scalar_prefetch = 0 : i64, scratch_operands = 0 : i64, tpu.core_type = #tpu.core_type<tc>, window_params = [{transform_indices = @transform_0, window_bounds = array<i64: 16, 128>}, {pipeline_mode = #tpu.pipeline_mode<synchronous>, transform_indices = @transform_1, window_bounds = array<i64: 128, 128>}, {pipeline_mode = #tpu.pipeline_mode<synchronous>, transform_indices = @transform_2, window_bounds = array<i64: 1, 128>}, {pipeline_mode = #tpu.pipeline_mode<synchronous>, transform_indices = @transform_3, window_bounds = array<i64: 128, 128>}, {pipeline_mode = #tpu.pipeline_mode<synchronous>, transform_indices = @transform_4, window_bounds = array<i64: 1, 128>}, {transform_indices = @transform_5, window_bounds = array<i64: 16, 128>}]} {
    %c0 = arith.constant 0 : index
    %c0_0 = arith.constant 0 : index
    %0 = vector.load %arg1[%c0, %c0_0] : memref<16x128xbf16, #tpu.memory_space<vmem>>, vector<16x128xbf16>
    %c0_1 = arith.constant 0 : index
    %c0_2 = arith.constant 0 : index
    %1 = vector.load %arg2[%c0_1, %c0_2] : memref<128x128xbf16, #tpu.memory_space<vmem>>, vector<128x128xbf16>
    %cst = arith.constant dense<0.000000e+00> : vector<16x128xf32>
    %2 = tpu.matmul %0, %1, %cst {dimension_numbers = #tpu.dot_dimension_numbers<[1], [0], [0], [1], [0, 0, 1, 1], [], []>} : vector<16x128xbf16>, vector<128x128xbf16>, vector<16x128xf32> -> vector<16x128xf32>
    %c0_3 = arith.constant 0 : index
    %c0_4 = arith.constant 0 : index
    %3 = vector.load %arg3[%c0_3, %c0_4] : memref<1x128xf32, #tpu.memory_space<vmem>>, vector<1x128xf32>
    %4 = vector.broadcast %3 : vector<1x128xf32> to vector<16x128xf32>
    %5 = arith.addf %2, %4 : vector<16x128xf32>
    %cst_5 = arith.constant 0.000000e+00 : f32
    %6 = vector.broadcast %cst_5 : f32 to vector<16x128xf32>
    %7 = arith.maximumf %5, %6 : vector<16x128xf32>
    %8 = arith.truncf %7 : vector<16x128xf32> to vector<16x128xbf16>
    %c0_6 = arith.constant 0 : index
    %c0_7 = arith.constant 0 : index
    %9 = vector.load %arg4[%c0_6, %c0_7] : memref<128x128xbf16, #tpu.memory_space<vmem>>, vector<128x128xbf16>
    %cst_8 = arith.constant dense<0.000000e+00> : vector<16x128xf32>
    %10 = tpu.matmul %8, %9, %cst_8 {dimension_numbers = #tpu.dot_dimension_numbers<[1], [0], [0], [1], [0, 0, 1, 1], [], []>} : vector<16x128xbf16>, vector<128x128xbf16>, vector<16x128xf32> -> vector<16x128xf32>
    %c0_9 = arith.constant 0 : index
    %c0_10 = arith.constant 0 : index
    %11 = vector.load %arg5[%c0_9, %c0_10] : memref<1x128xf32, #tpu.memory_space<vmem>>, vector<1x128xf32>
    %12 = vector.broadcast %11 : vector<1x128xf32> to vector<16x128xf32>
    %13 = arith.addf %10, %12 : vector<16x128xf32>
    %c0_11 = arith.constant 0 : index
    %c0_12 = arith.constant 0 : index
    %14 = vector.load %arg6[%c0_11, %c0_12] : memref<16x128xf32, #tpu.memory_space<vmem>>, vector<16x128xf32>
    tpu.vector_store %arg6[%c0_11, %c0_12], %13 {strides = array<i32>} : memref<16x128xf32, #tpu.memory_space<vmem>>, vector<16x128xf32>,
    return
  }
  func.func @transform_0(%arg0: i32) -> (i32, i32) {
    %c0_i32 = arith.constant 0 : i32
    %c0_i32_0 = arith.constant 0 : i32
    return %arg0, %c0_i32 : i32, i32
  }
  func.func @transform_1(%arg0: i32) -> (i32, i32) {
    %c0_i32 = arith.constant 0 : i32
    %c0_i32_0 = arith.constant 0 : i32
    %c0_i32_1 = arith.constant 0 : i32
    return %c0_i32, %c0_i32_0 : i32, i32
  }
  func.func @transform_2(%arg0: i32) -> (i32, i32) {
    %c0_i32 = arith.constant 0 : i32
    %c0_i32_0 = arith.constant 0 : i32
    %c0_i32_1 = arith.constant 0 : i32
    return %c0_i32, %c0_i32_0 : i32, i32
  }
  func.func @transform_3(%arg0: i32) -> (i32, i32) {
    %c0_i32 = arith.constant 0 : i32
    %c0_i32_0 = arith.constant 0 : i32
    %c0_i32_1 = arith.constant 0 : i32
    return %c0_i32, %c0_i32_0 : i32, i32
  }
  func.func @transform_4(%arg0: i32) -> (i32, i32) {
    %c0_i32 = arith.constant 0 : i32
    %c0_i32_0 = arith.constant 0 : i32
    %c0_i32_1 = arith.constant 0 : i32
    return %c0_i32, %c0_i32_0 : i32, i32
  }
  func.func @transform_5(%arg0: i32) -> (i32, i32) {
    %c0_i32 = arith.constant 0 : i32
    %c0_i32_0 = arith.constant 0 : i32
    return %arg0, %c0_i32 : i32, i32
  }
}

</mosaic_0001>

<bundles_post_ra>
// kernel: tpu_custom_call.1
= control target key start
LH: loop header
LB: loop body
LE: loop exit
PB: predicated region body
PF: predicated region fallthrough
CT: control target
= control target key end

     0   :  { %10 = vsyncpa [#allocation3], 0  ;;  %s566_s0 = inlined_call_operand.hbm [shape: bf16[16,128], index: 0, kind: input, shape index: {}]   ;;  %s567_s1 = inlined_call_operand.hbm [shape: bf16[128,128], index: 1, kind: input, shape index: {}]   ;;  %s568_s2 = inlined_call_operand.vmem [shape: f32[1,128], index: 2, kind: input, shape index: {}]   ;;  %s569_s3 = inlined_call_operand.hbm [shape: bf16[128,128], index: 3, kind: input, shape index: {}]   ;;  %s570_s4 = inlined_call_operand.vmem [shape: f32[1,128], index: 4, kind: input, shape index: {}]   ;;  %s571_s5 = inlined_call_operand.hbm [shape: f32[16,128], index: 5, kind: output, shape index: {}]  }
   0x1   :  { %11 = vsyncpa [#allocation6], 0 }
   0x2   :  { %12 = vsyncpa [#allocation4], 0  ;;  %s508_s18 = smov [#allocation5]   ;;  %s509_s20 = smov [#allocation2]  }
   0x3   :  { %s30_s19 = sshll.u32 %s508_s18, 4  ;;  %s18_s21 = sshll.u32 %s509_s20, 4  ;;  %s31_s19 = int_to_ptr.vmem [resolvable:$true] %s30_s19  ;;  %s19_s21 = int_to_ptr.vmem [resolvable:$true] %s18_s21 }
   0x4   :  { %s430_s22 = scalar_lea.vmem %s31_s19, 1024  ;;  %p435_p1 = scmp.lt.s32.totalorder %s31_s19, %s31_s19 }
   0x5   :  { %p431_p0 = scmp.ne.s32.totalorder %s31_s19, %s430_s22  ;;  %p436_p2 = scmp.lt.s32.totalorder %s430_s22, %s430_s22 }
   0x7   :  { %p437_p3 = por %p436_p2, %p435_p1 }
   0x9   :  { %p438_p4 = pnand %p437_p3, %p431_p0 }
   0xb   :  { %441 = shalt.err (!%p438_p4)
}
   0xc   :  { %s510_s23 = smov 64   ;;  %s511_s24 = smov 4  }
   0xd   :  { %36 = dma.hbm_to_vmem [thread:$0]  %s567_s1, 1024, %s31_s19, [#allocation6], %s510_s23, %s510_s23, %s511_s24  }
   0xe   :  { %s450_s27 = scalar_lea.vmem %s19_s21, 128  ;;  %p455_p6 = scmp.lt.s32.totalorder %s19_s21, %s19_s21 }
   0xf   :  { %p451_p5 = scmp.ne.s32.totalorder %s19_s21, %s450_s27  ;;  %p456_p7 = scmp.lt.s32.totalorder %s450_s27, %s450_s27 }
  0x11   :  { %p457_p8 = por %p456_p7, %p455_p6 }
  0x13   :  { %p458_p9 = pnand %p457_p8, %p451_p5 }
  0x15   :  { %461 = shalt.err (!%p458_p9)
}
  0x16   :  { %24 = dma.hbm_to_vmem [thread:$0]  %s566_s0, 128, %s19_s21, [#allocation3], %s510_s23, %s510_s23, %s511_s24  }
  0x17   :  { %s512_s30 = smov [#allocation7]  }
  0x18   :  { %s44_s6 = sshll.u32 %s512_s30, 4  ;;  %s45_s6 = int_to_ptr.vmem [resolvable:$true] %s44_s6 }
  0x19   :  { %s470_s7 = scalar_lea.vmem %s45_s6, 1024  ;;  %p475_p11 = scmp.lt.s32.totalorder %s45_s6, %s45_s6 }
  0x1a   :  { %p471_p10 = scmp.ne.s32.totalorder %s45_s6, %s470_s7  ;;  %p476_p12 = scmp.lt.s32.totalorder %s470_s7, %s470_s7 }
  0x1c   :  { %p477_p13 = por %p476_p12, %p475_p11 }
  0x1e   :  { %p478_p0 = pnand %p477_p13, %p471_p10 }
  0x20   :  { %481 = shalt.err (!%p478_p0)
}
  0x21   :  { %50 = dma.hbm_to_vmem [thread:$0]  %s569_s3, 1024, %s45_s6, [#allocation6], %s510_s23, %s510_s23, %s511_s24  }
  0x22   :  { %502 = dma.done.wait [#allocation3], 128  }
  0x23   :  { %503 = vsyncadd [#allocation3], 4294967168 }
  0x24   :  { %504 = dma.done.wait [#allocation6], 2048  }
  0x25   :  { %505 = vsyncadd [#allocation6], 4294965248  ;;  %v513_v0 = vmov 0.0   ;;  %vm514_vm0 = vmmov 0   ;;  %v405_v1 = vld [vmem:[#allocation5 + $0x38] sm:$0xff]   ;;  %v406_v2 = vld [vmem:[#allocation5 + $0x30] sm:$0xff]  }
  0x26   :  { %355 = vmatprep.subr.bf16.mxu0 %v513_v0  ;;  %371 = vmatprep.mubr.msk.bf16.mxu0 %vm514_vm0, %v513_v0  ;;  %v407_v3 = vld [vmem:[#allocation5 + $0x28] sm:$0xff]   ;;  %v414_v4 = vld [vmem:[#allocation7 + $0x38] sm:$0xff]   ;;  %v408_v5 = vld [vmem:[#allocation5 + $0x20] sm:$0xff]   ;;  %s515_s11 = smov [#allocation8]  }
  0x27   :  { %375 = vmatprep.subr.bf16.mxu1 %v513_v0  ;;  %391 = vmatprep.mubr.msk.bf16.mxu1 %vm514_vm0, %v513_v0  ;;  %v415_v6 = vld [vmem:[#allocation7 + $0x30] sm:$0xff]   ;;  %v409_v7 = vld [vmem:[#allocation5 + $0x18] sm:$0xff]   ;;  %v416_v8 = vld [vmem:[#allocation7 + $0x28] sm:$0xff]   ;;  %s305_s12 = sshll.u32 %s515_s11, 4  ;;  %s306_s12 = int_to_ptr.vmem [resolvable:$true] %s305_s12 }
  0x28   :  { %356 = vmatpush3.bf16.msra.mxu0 %v405_v1  ;;  %376 = vmatpush3.bf16.msra.mxu1 %v414_v4  ;;  %v410_v9 = vld [vmem:[#allocation5 + $0x10] sm:$0xff]   ;;  %v417_v10 = vld [vmem:[#allocation7 + $0x20] sm:$0xff]   ;;  %v411_v11 = vld [vmem:[#allocation5 + $0x8] sm:$0xff]   ;;  %p487_p2 = scmp.lt.s32.totalorder %s306_s12, %s306_s12 }
  0x29   :  { %357 = vmatprep.subr.bf16.mxu0 %v513_v0  ;;  %377 = vmatprep.subr.bf16.mxu1 %v513_v0  ;;  %v418_v12 = vld [vmem:[#allocation7 + $0x18] sm:$0xff]   ;;  %v412_v13 = vld [vmem:[#allocation5] sm:$0xff]   ;;  %v419_v15 = vld [vmem:[#allocation7 + $0x10] sm:$0xff]  }
  0x2a   :  { %v413_v14 = vld [vmem:[#allocation2] sm:$0xff]   ;;  %v420_v16 = vld [vmem:[#allocation7 + $0x8] sm:$0xff]   ;;  %v421_v17 = vld [vmem:[#allocation7] sm:$0xff]  }
  0x2b   :  { %v318_v18 = vld [vmem:[%s568_s2] ss:$0 sm:$0xff]  ;;  %s482_s2 = scalar_lea.vmem %s306_s12, 256 }
  0x2c   :  { %358 = vmatpush3.bf16.msra.mxu0 %v406_v2  ;;  %378 = vmatpush3.bf16.msra.mxu1 %v415_v6  ;;  %v328_v28 = vld [vmem:[%s570_s4] ss:$0 sm:$0xff]  ;;  %p483_p1 = scmp.ne.s32.totalorder %s306_s12, %s482_s2  ;;  %p488_p3 = scmp.lt.s32.totalorder %s482_s2, %s482_s2 }
  0x2d   :  { %359 = vmatprep.subr.bf16.mxu0 %v513_v0  ;;  %379 = vmatprep.subr.bf16.mxu1 %v513_v0 }
  0x2e   :  { %p489_p4 = por %p488_p3, %p487_p2 }
  0x30   :  { %360 = vmatpush3.bf16.msra.mxu0 %v407_v3  ;;  %380 = vmatpush3.bf16.msra.mxu1 %v416_v8  ;;  %p490_p5 = pnand %p489_p4, %p483_p1 }
  0x31   :  { %361 = vmatprep.subr.bf16.mxu0 %v513_v0  ;;  %381 = vmatprep.subr.bf16.mxu1 %v513_v0 }
  0x34   :  { %362 = vmatpush3.bf16.msra.mxu0 %v408_v5  ;;  %382 = vmatpush3.bf16.msra.mxu1 %v417_v10 }
  0x35   :  { %363 = vmatprep.subr.bf16.mxu0 %v513_v0  ;;  %383 = vmatprep.subr.bf16.mxu1 %v513_v0 }
  0x38   :  { %364 = vmatpush3.bf16.msra.mxu0 %v409_v7  ;;  %384 = vmatpush3.bf16.msra.mxu1 %v418_v12 }
  0x39   :  { %365 = vmatprep.subr.bf16.mxu0 %v513_v0  ;;  %385 = vmatprep.subr.bf16.mxu1 %v513_v0 }
  0x3c   :  { %366 = vmatpush3.bf16.msra.mxu0 %v410_v9  ;;  %386 = vmatpush3.bf16.msra.mxu1 %v419_v15 }
  0x3d   :  { %367 = vmatprep.subr.bf16.mxu0 %v513_v0  ;;  %387 = vmatprep.subr.bf16.mxu1 %v513_v0 }
  0x40   :  { %368 = vmatpush3.bf16.msra.mxu0 %v411_v11  ;;  %388 = vmatpush3.bf16.msra.mxu1 %v420_v16 }
  0x41   :  { %369 = vmatprep.subr.bf16.mxu0 %v513_v0  ;;  %389 = vmatprep.subr.bf16.mxu1 %v513_v0 }
  0x44   :  { %370 = vmatpush3.bf16.msra.mxu0 %v412_v13  ;;  %390 = vmatpush3.bf16.msra.mxu1 %v421_v17 }
  0x47   :  { %372 = vmatmul.mubr.bf16.vlgmr.msra.gmra.mxu0 %v413_v14 }
 0x107   :  { %v176_v19 = vpop.f32.mrf.mxu0 }
 0x108   :  { %v177_v21 = vadd.f32 %v318_v18, %v176_v19 }
 0x109   :  { %v373_v20 = vpop.f32.mrf.mxu0 }
 0x10a   :  { %v183_v25 = vmax.f32 %v177_v21, 0.0 }
 0x10b   :  { %v179_v22 = vpop.f32.mrf.mxu0 }
 0x10c   :  { %v180_v23 = vadd.f32 %v318_v18, %v179_v22 }
 0x10d   :  { %v374_v24 = vpop.f32.mrf.mxu0 }
 0x10e   :  { %v184_v26 = vmax.f32 %v180_v23, 0.0 }
 0x110   :  { %v185_v27 = vpack.c.bf16 %v184_v26, %v183_v25 }
 0x112   :  { %392 = vmatmul.mubr.bf16.vlgmr.msra.gmra.mxu1 %v185_v27 }
 0x1d2   :  { %v291_v29 = vpop.f32.mrf.mxu1 }
 0x1d3   :  { %v292_v30 = vadd.f32 %v328_v28, %v291_v29 }
 0x1d4   :  { %v393_v31 = vpop.f32.mrf.mxu1 }
 0x1d5   :  { %298 = vst [vmem:[#allocation8] sm:$0xff] %v292_v30 }
 0x1d6   :  { %v294_v32 = vpop.f32.mrf.mxu1 }
 0x1d7   :  { %v295_v33 = vadd.f32 %v328_v28, %v294_v32 }
 0x1d8   :  { %v394_v34 = vpop.f32.mrf.mxu1 }
 0x1d9   :  { %299 = vst [vmem:[#allocation8 + $0x8] sm:$0xff] %v295_v33 }
 0x1da   :  { %493 = shalt.err (!%p490_p5)
}
 0x1db   :  { %s516_s13 = smov 128   ;;  %s517_s4 = smov 8  }
 0x1dc   :  { %311 = dma.vmem_to_hbm [thread:$0]  %s306_s12, 256, %s571_s5, [#allocation4], %s516_s13, %s516_s13, %s517_s4  }
 0x1dd   :  { %506 = dma.done.wait [#allocation4], 256  }
 0x1de   :  { %507 = vsyncadd [#allocation4], 4294967040 }
 0x1df   :  { %315 = vsyncpa [#allocation3], 1 }
 0x1e0   :  { %316 = vsyncpa [#allocation6], 1 }
 0x1e1   :  { %317 = vsyncpa [#allocation4], 1 }

</bundles_post_ra>
